<compile_context>
chip_gen: v6e
topology: v6e:2x2x1
jax: 0.10.0
libtpu: 0.0.40
codegen_flags: <defaults>
</compile_context>

<pallas_src>
import functools

import jax
import jax.numpy as jnp
from jax.experimental import pallas as pl
from jax.experimental.pallas import tpu as pltpu


# ----------------------------- small helpers ---------------------------------

def _round_up(n, m):
    return ((n + m - 1) // m) * m


def _tpu_budget():
    """(target_rows for the batch tile, vmem_limit_bytes) per TPU generation."""
    vmem_cap = None
    try:
        info = pltpu.get_tpu_info()
        vmem_cap = getattr(info, "vmem_capacity_bytes", None)
    except Exception:
        vmem_cap = None
    if vmem_cap is not None and vmem_cap >= 100 * 1024 * 1024:
        # v5e / v6e: 128 MiB physical VMEM -> bigger tiles, generous limit.
        return 1024, 96 * 1024 * 1024
    # v7x (64 MiB) or unknown: conservative budget that fits everywhere.
    return 512, 40 * 1024 * 1024


def _layernorm(x, w, b, eps=1e-5):
    # PyTorch LayerNorm semantics (fp32 statistics, biased variance).
    x32 = x.astype(jnp.float32)
    mu = jnp.mean(x32, axis=-1, keepdims=True)
    var = jnp.mean(jnp.square(x32 - mu), axis=-1, keepdims=True)
    return (x32 - mu) * jax.lax.rsqrt(var + eps) * w + b


# --------------------------- residual attention block ------------------------

def _block_kernel(x_ref,
                  wqkv_ref, bqkv_ref, wo_ref, bo_ref,
                  ln1w_ref, ln1b_ref, ln2w_ref, ln2b_ref,
                  wfc_ref, bfc_ref, wpr_ref, bpr_ref,
                  o_ref, *, n_head, seq_len):
    Bt, Lp, W = x_ref.shape
    d_head = W // n_head

    # residual stream arrives bf16; all in-kernel math in f32.
    x = x_ref[...].astype(jnp.float32).reshape(Bt * Lp, W)

    # ---- attention branch: x + attn(ln_1(x)) ----
    h = _layernorm(x, ln1w_ref[...], ln1b_ref[...])
    # 1/sqrt(d_head) is already folded into the q-third of wqkv/bqkv at init.
    qkv = jnp.dot(h.astype(jnp.bfloat16), wqkv_ref[...],
                  preferred_element_type=jnp.float32) + bqkv_ref[...]
    q = qkv[:, :W].astype(jnp.bfloat16).reshape(Bt, Lp, W)
    k = qkv[:, W:2 * W].astype(jnp.bfloat16).reshape(Bt, Lp, W)
    v = qkv[:, 2 * W:].astype(jnp.bfloat16).reshape(Bt, Lp, W)

    # batch-invariant causal + key-padding mask, built once ([Lp, Lp] only);
    # large finite negative so exp underflows to exactly 0 (no -inf NaN risk).
    rows = jax.lax.broadcasted_iota(jnp.int32, (Lp, Lp), 0)
    cols = jax.lax.broadcasted_iota(jnp.int32, (Lp, Lp), 1)
    mask = jnp.where((cols > rows) | (cols >= seq_len),
                     jnp.float32(-1e30), jnp.float32(0.0))

    # Per-head attention; each head's output is folded straight into the
    # output projection (one f32 accumulator, no concat, bounded live ranges).
    attn_acc = jnp.zeros((Bt * Lp, W), jnp.float32)
    for hd in range(n_head):
        sl = slice(hd * d_head, (hd + 1) * d_head)
        s = jnp.einsum('bqd,bkd->bqk', q[:, :, sl], k[:, :, sl],
                       preferred_element_type=jnp.float32)
        s = s + mask                                   # broadcast over Bt
        s = s - jnp.max(s, axis=-1, keepdims=True)
        p = jnp.exp(s)                                 # f32 softmax
        p = p * pl.reciprocal(jnp.sum(p, axis=-1, keepdims=True), approx=True)
        ho = jnp.einsum('bqk,bkd->bqd', p.astype(jnp.bfloat16), v[:, :, sl],
                        preferred_element_type=jnp.float32)
        attn_acc = attn_acc + jnp.dot(
            ho.reshape(Bt * Lp, d_head).astype(jnp.bfloat16),
            wo_ref[hd * d_head:(hd + 1) * d_head, :],
            preferred_element_type=jnp.float32)

    x = x + attn_acc + bo_ref[...]                     # f32 residual

    # ---- MLP branch: x + mlp(ln_2(x)) ----
    h2 = _layernorm(x, ln2w_ref[...], ln2b_ref[...])
    ff = jnp.dot(h2.astype(jnp.bfloat16), wfc_ref[...],
                 preferred_element_type=jnp.float32) + bfc_ref[...]
    ff = ff * jax.nn.sigmoid(1.702 * ff)               # QuickGELU (f32)
    ff = jnp.dot(ff.astype(jnp.bfloat16), wpr_ref[...],
                 preferred_element_type=jnp.float32) + bpr_ref[...]

    o_ref[...] = (x + ff).reshape(Bt, Lp, W).astype(o_ref.dtype)


def residual_attention_block(x, blk, n_head, seq_len, bt, vmem_limit):
    """x: [B, L_pad, W] bf16.  Weights stored [in, out] bf16, biases (1, N)."""
    B, Lp, W = x.shape
    params = (
        blk["wqkv"], blk["bqkv"], blk["wo"], blk["bo"],
        blk["ln1w"], blk["ln1b"], blk["ln2w"], blk["ln2b"],
        blk["wfc"], blk["bfc"], blk["wpr"], blk["bpr"],
    )

    def const_spec(a):
        # Block index never changes across the batch grid -> single-buffer it.
        n = a.ndim
        return pl.BlockSpec(a.shape, lambda b, _n=n: (0,) * _n,
                            pipeline_mode=pl.Buffered(1))

    in_specs = [pl.BlockSpec((bt, Lp, W), lambda b: (b, 0, 0))]
    in_specs += [const_spec(p) for p in params]

    return pl.pallas_call(
        functools.partial(_block_kernel, n_head=n_head, seq_len=seq_len),
        out_shape=jax.ShapeDtypeStruct((B, Lp, W), jnp.bfloat16),
        grid=(B // bt,),
        in_specs=in_specs,
        out_specs=pl.BlockSpec((bt, Lp, W), lambda b: (b, 0, 0)),
        compiler_params=pltpu.CompilerParams(
            dimension_semantics=("parallel",),
            vmem_limit_bytes=vmem_limit),
    )(x, *params)


# ------------------------- final LayerNorm + projection ----------------------

def _final_kernel(x_ref, lnw_ref, lnb_ref, proj_ref, o_ref):
    h = _layernorm(x_ref[...], lnw_ref[...], lnb_ref[...])          # [B, W] f32
    o_ref[...] = jnp.dot(h.astype(jnp.bfloat16), proj_ref[...],
                         preferred_element_type=jnp.float32)


def final_project(x_eot, ln_w, ln_b, proj):
    """x_eot: [B, W] (EOT rows, bf16), proj: [W, E] bf16 -> [B, E] f32."""
    B, W = x_eot.shape
    E = proj.shape[1]
    return pl.pallas_call(
        _final_kernel,
        out_shape=jax.ShapeDtypeStruct((B, E), jnp.float32),
    )(x_eot, ln_w, ln_b, proj)


# --------------------------------- parameters ---------------------------------

def init_params(key, vocab, ctx_len, width, layers, heads, embed_dim):
    """Weights stored once in [in, out] bf16; biases / LN params as (1, N) f32.
    The 1/sqrt(d_head) attention scale is folded into the q-third of wqkv."""
    proj_std = (width ** -0.5) * ((2 * layers) ** -0.5)
    attn_std = width ** -0.5
    fc_std = (2 * width) ** -0.5
    d_head = width // heads
    scale = d_head ** -0.5

    ks = jax.random.split(key, 3 + layers)
    params = {
        "tok_emb": 0.02 * jax.random.normal(ks[0], (vocab, width), jnp.float32),
        "pos_emb": 0.01 * jax.random.normal(ks[1], (ctx_len, width), jnp.float32),
        "text_proj": ((width ** -0.5)
                      * jax.random.normal(ks[2], (width, embed_dim), jnp.float32)
                      ).astype(jnp.bfloat16),
        "ln_final_w": jnp.ones((1, width), jnp.float32),
        "ln_final_b": jnp.zeros((1, width), jnp.float32),
        "blocks": [],
    }
    for i in range(layers):
        bk = jax.random.split(ks[3 + i], 4)
        wqkv = attn_std * jax.random.normal(bk[0], (width, 3 * width), jnp.float32)
        # fold softmax scale into the q projection (weights + bias)
        wqkv = wqkv.at[:, :width].multiply(scale)
        params["blocks"].append(dict(
            wqkv=wqkv.astype(jnp.bfloat16),
            bqkv=jnp.zeros((1, 3 * width), jnp.float32),
            wo=(proj_std * jax.random.normal(bk[1], (width, width),
                                             jnp.float32)).astype(jnp.bfloat16),
            bo=jnp.zeros((1, width), jnp.float32),
            ln1w=jnp.ones((1, width), jnp.float32),
            ln1b=jnp.zeros((1, width), jnp.float32),
            ln2w=jnp.ones((1, width), jnp.float32),
            ln2b=jnp.zeros((1, width), jnp.float32),
            wfc=(fc_std * jax.random.normal(bk[2], (width, 4 * width),
                                            jnp.float32)).astype(jnp.bfloat16),
            bfc=jnp.zeros((1, 4 * width), jnp.float32),
            wpr=(proj_std * jax.random.normal(bk[3], (4 * width, width),
                                              jnp.float32)).astype(jnp.bfloat16),
            bpr=jnp.zeros((1, width), jnp.float32),
        ))
    return params


# ----------------------------------- forward ----------------------------------

def vit_text_forward(text, params, n_head):
    """text: [B, L] int32 token ids -> [B, embed_dim] f32."""
    B, L = text.shape

    # token embedding + positional embedding (glue, plain JAX gather)
    x = params["tok_emb"][text] + params["pos_emb"][None, :, :]      # [B, L, W]
    x = x.astype(jnp.bfloat16)                 # residual stream carried in bf16

    # pad the sequence only to a sublane-friendly multiple of 8 (77 -> 80);
    # padded key columns are masked inside the kernel, padded rows discarded.
    Lp = _round_up(L, 8)
    if Lp != L:
        x = jnp.pad(x, ((0, 0), (0, Lp - L), (0, 0)))

    # per-generation batch tile + VMEM limit; pad B up to a multiple of the
    # tile so odd B does not degenerate to tiny grid steps.
    target_rows, vmem_limit = _tpu_budget()
    bt = max(1, min(B, target_rows // Lp))
    Bp = _round_up(B, bt)
    if Bp != B:
        x = jnp.pad(x, ((0, Bp - B), (0, 0), (0, 0)))

    # transformer: each layer is one fused Pallas kernel, grid over batch tiles
    for blk in params["blocks"]:
        x = residual_attention_block(x, blk, n_head, L, bt, vmem_limit)

    x = x[:B]                                                         # drop pad

    # gather EOT token (argmax over token ids; assumes EOT has the highest id,
    # as in the original CLIP tokenizer), then LN + projection in Pallas
    eot = jnp.argmax(text, axis=-1)                                   # [B]
    x_eot = x[jnp.arange(B), eot]                                     # [B, W]
    out = final_project(x_eot, params["ln_final_w"], params["ln_final_b"],
                        params["text_proj"])                          # [B, E]
    return out


# ------------------------------------ main ------------------------------------

if __name__ == "__main__":
    embed_dim = 16
    context_length = 8
    vocab_size = 64
    transformer_width = 32
    transformer_heads = 2
    transformer_layers = 2
    batch = 2

    key = jax.random.PRNGKey(0)
    k_params, k_text = jax.random.split(key)

    params = init_params(k_params, vocab_size, context_length,
                         transformer_width, transformer_layers,
                         transformer_heads, embed_dim)
    text = jax.random.randint(k_text, (batch, context_length), 0, vocab_size,
                              dtype=jnp.int32)

    fwd = jax.jit(functools.partial(vit_text_forward, n_head=transformer_heads))
    out = fwd(text, params)
    out = jax.block_until_ready(out)
    assert out.shape == (batch, embed_dim)
    assert bool(jnp.all(jnp.isfinite(out)))
    print("KERNEL_OK")
</pallas_src>

<mosaic_0001>
module attributes {stable_mosaic.version = 11 : i64} {
  func.func @_block_kernel(%arg0: i32, %arg1: memref<2x8x32xbf16, #tpu.memory_space<vmem>>, %arg2: memref<32x96xbf16, #tpu.memory_space<vmem>>, %arg3: memref<1x96xf32, #tpu.memory_space<vmem>>, %arg4: memref<32x32xbf16, #tpu.memory_space<vmem>>, %arg5: memref<1x32xf32, #tpu.memory_space<vmem>>, %arg6: memref<1x32xf32, #tpu.memory_space<vmem>>, %arg7: memref<1x32xf32, #tpu.memory_space<vmem>>, %arg8: memref<1x32xf32, #tpu.memory_space<vmem>>, %arg9: memref<1x32xf32, #tpu.memory_space<vmem>>, %arg10: memref<32x128xbf16, #tpu.memory_space<vmem>>, %arg11: memref<1x128xf32, #tpu.memory_space<vmem>>, %arg12: memref<128x32xbf16, #tpu.memory_space<vmem>>, %arg13: memref<1x32xf32, #tpu.memory_space<vmem>>, %arg14: memref<2x8x32xbf16, #tpu.memory_space<vmem>>) attributes {dimension_semantics = [#tpu.dimension_semantics<parallel>], iteration_bounds = array<i64: 1>, scalar_prefetch = 0 : i64, scratch_operands = 0 : i64, tpu.core_type = #tpu.core_type<tc>, window_params = [{transform_indices = @transform_0, window_bounds = array<i64: 2, 8, 32>}, {pipeline_mode = #tpu.pipeline_mode<synchronous>, transform_indices = @transform_1, window_bounds = array<i64: 32, 96>}, {pipeline_mode = #tpu.pipeline_mode<synchronous>, transform_indices = @transform_2, window_bounds = array<i64: 1, 96>}, {pipeline_mode = #tpu.pipeline_mode<synchronous>, transform_indices = @transform_3, window_bounds = array<i64: 32, 32>}, {pipeline_mode = #tpu.pipeline_mode<synchronous>, transform_indices = @transform_4, window_bounds = array<i64: 1, 32>}, {pipeline_mode = #tpu.pipeline_mode<synchronous>, transform_indices = @transform_5, window_bounds = array<i64: 1, 32>}, {pipeline_mode = #tpu.pipeline_mode<synchronous>, transform_indices = @transform_6, window_bounds = array<i64: 1, 32>}, {pipeline_mode = #tpu.pipeline_mode<synchronous>, transform_indices = @transform_7, window_bounds = array<i64: 1, 32>}, {pipeline_mode = #tpu.pipeline_mode<synchronous>, transform_indices = @transform_8, window_bounds = array<i64: 1, 32>}, {pipeline_mode = #tpu.pipeline_mode<synchronous>, transform_indices = @transform_9, window_bounds = array<i64: 32, 128>}, {pipeline_mode = #tpu.pipeline_mode<synchronous>, transform_indices = @transform_10, window_bounds = array<i64: 1, 128>}, {pipeline_mode = #tpu.pipeline_mode<synchronous>, transform_indices = @transform_11, window_bounds = array<i64: 128, 32>}, {pipeline_mode = #tpu.pipeline_mode<synchronous>, transform_indices = @transform_12, window_bounds = array<i64: 1, 32>}, {transform_indices = @transform_13, window_bounds = array<i64: 2, 8, 32>}]} {
    %c0 = arith.constant 0 : index
    %c0_0 = arith.constant 0 : index
    %c0_1 = arith.constant 0 : index
    %0 = vector.load %arg1[%c0, %c0_0, %c0_1] : memref<2x8x32xbf16, #tpu.memory_space<vmem>>, vector<2x8x32xbf16>
    %1 = arith.extf %0 : vector<2x8x32xbf16> to vector<2x8x32xf32>
    %2 = vector.shape_cast %1 : vector<2x8x32xf32> to vector<16x32xf32>
    %c0_2 = arith.constant 0 : index
    %c0_3 = arith.constant 0 : index
    %3 = vector.load %arg6[%c0_2, %c0_3] : memref<1x32xf32, #tpu.memory_space<vmem>>, vector<1x32xf32>
    %c0_4 = arith.constant 0 : index
    %c0_5 = arith.constant 0 : index
    %4 = vector.load %arg7[%c0_4, %c0_5] : memref<1x32xf32, #tpu.memory_space<vmem>>, vector<1x32xf32>
    %cst = arith.constant dense<0.000000e+00> : vector<16xf32>
    %5 = vector.multi_reduction <add>, %2, %cst [1] : vector<16x32xf32> to vector<16xf32>
    %6 = vector.shape_cast %5 : vector<16xf32> to vector<16x1xf32>
    %cst_6 = arith.constant 3.200000e+01 : f32
    %7 = vector.broadcast %cst_6 : f32 to vector<16x1xf32>
    %8 = arith.divf %6, %7 : vector<16x1xf32>
    %9 = vector.broadcast %8 : vector<16x1xf32> to vector<16x32xf32>
    %10 = arith.subf %2, %9 : vector<16x32xf32>
    %11 = arith.mulf %10, %10 : vector<16x32xf32>
    %cst_7 = arith.constant dense<0.000000e+00> : vector<16xf32>
    %12 = vector.multi_reduction <add>, %11, %cst_7 [1] : vector<16x32xf32> to vector<16xf32>
    %13 = vector.shape_cast %12 : vector<16xf32> to vector<16x1xf32>
    %cst_8 = arith.constant 3.200000e+01 : f32
    %14 = vector.broadcast %cst_8 : f32 to vector<16x1xf32>
    %15 = arith.divf %13, %14 : vector<16x1xf32>
    %16 = vector.broadcast %8 : vector<16x1xf32> to vector<16x32xf32>
    %17 = arith.subf %2, %16 : vector<16x32xf32>
    %cst_9 = arith.constant 9.99999974E-6 : f32
    %18 = vector.broadcast %cst_9 : f32 to vector<16x1xf32>
    %19 = arith.addf %15, %18 : vector<16x1xf32>
    %20 = math.rsqrt %19 : vector<16x1xf32>
    %21 = vector.broadcast %20 : vector<16x1xf32> to vector<16x32xf32>
    %22 = arith.mulf %17, %21 : vector<16x32xf32>
    %23 = vector.broadcast %3 : vector<1x32xf32> to vector<16x32xf32>
    %24 = arith.mulf %22, %23 : vector<16x32xf32>
    %25 = vector.broadcast %4 : vector<1x32xf32> to vector<16x32xf32>
    %26 = arith.addf %24, %25 : vector<16x32xf32>
    %27 = arith.truncf %26 : vector<16x32xf32> to vector<16x32xbf16>
    %c0_10 = arith.constant 0 : index
    %c0_11 = arith.constant 0 : index
    %28 = vector.load %arg2[%c0_10, %c0_11] : memref<32x96xbf16, #tpu.memory_space<vmem>>, vector<32x96xbf16>
    %cst_12 = arith.constant dense<0.000000e+00> : vector<16x96xf32>
    %29 = tpu.matmul %27, %28, %cst_12 {dimension_numbers = #tpu.dot_dimension_numbers<[1], [0], [0], [1], [0, 0, 1, 1], [], []>} : vector<16x32xbf16>, vector<32x96xbf16>, vector<16x96xf32> -> vector<16x96xf32>
    %c0_13 = arith.constant 0 : index
    %c0_14 = arith.constant 0 : index
    %30 = vector.load %arg3[%c0_13, %c0_14] : memref<1x96xf32, #tpu.memory_space<vmem>>, vector<1x96xf32>
    %31 = vector.broadcast %30 : vector<1x96xf32> to vector<16x96xf32>
    %32 = arith.addf %29, %31 : vector<16x96xf32>
    %33 = vector.extract_strided_slice %32 {offsets = [0, 0], sizes = [16, 32], strides = [1, 1]} : vector<16x96xf32> to vector<16x32xf32>
    %34 = arith.truncf %33 : vector<16x32xf32> to vector<16x32xbf16>
    %35 = vector.shape_cast %34 : vector<16x32xbf16> to vector<2x8x32xbf16>
    %36 = vector.extract_strided_slice %32 {offsets = [0, 32], sizes = [16, 32], strides = [1, 1]} : vector<16x96xf32> to vector<16x32xf32>
    %37 = arith.truncf %36 : vector<16x32xf32> to vector<16x32xbf16>
    %38 = vector.shape_cast %37 : vector<16x32xbf16> to vector<2x8x32xbf16>
    %39 = vector.extract_strided_slice %32 {offsets = [0, 64], sizes = [16, 32], strides = [1, 1]} : vector<16x96xf32> to vector<16x32xf32>
    %40 = arith.truncf %39 : vector<16x32xf32> to vector<16x32xbf16>
    %41 = vector.shape_cast %40 : vector<16x32xbf16> to vector<2x8x32xbf16>
    %42 = tpu.iota {dimensions = array<i32: 0>} : vector<8x8xi32>
    %43 = tpu.iota {dimensions = array<i32: 1>} : vector<8x8xi32>
    %44 = arith.cmpi sgt, %43, %42 : vector<8x8xi32>
    %c8_i32 = arith.constant 8 : i32
    %45 = vector.broadcast %c8_i32 : i32 to vector<8x8xi32>
    %46 = arith.cmpi sge, %43, %45 : vector<8x8xi32>
    %47 = arith.ori %44, %46 : vector<8x8xi1>
    %cst_15 = arith.constant -1.000000e+30 : f32
    %cst_16 = arith.constant 0.000000e+00 : f32
    %48 = vector.broadcast %cst_15 : f32 to vector<8x8xf32>
    %49 = vector.broadcast %cst_16 : f32 to vector<8x8xf32>
    %50 = arith.select %47, %48, %49 : vector<8x8xi1>, vector<8x8xf32>
    %cst_17 = arith.constant 0.000000e+00 : f32
    %51 = vector.broadcast %cst_17 : f32 to vector<16x32xf32>
    %52 = vector.extract_strided_slice %35 {offsets = [0, 0, 0], sizes = [2, 8, 16], strides = [1, 1, 1]} : vector<2x8x32xbf16> to vector<2x8x16xbf16>
    %53 = vector.extract_strided_slice %38 {offsets = [0, 0, 0], sizes = [2, 8, 16], strides = [1, 1, 1]} : vector<2x8x32xbf16> to vector<2x8x16xbf16>
    "tpu.trace_start"() <{level = 10 : i32, message = "bqd,bkd->bqk"}> : () -> ()
    %cst_18 = arith.constant dense<0.000000e+00> : vector<2x8x8xf32>
    %54 = tpu.matmul %52, %53, %cst_18 {dimension_numbers = #tpu.dot_dimension_numbers<[2], [2], [1], [1], [0, 0, 0, 1, 1, 1], [0], [0]>} : vector<2x8x16xbf16>, vector<2x8x16xbf16>, vector<2x8x8xf32> -> vector<2x8x8xf32>
    "tpu.trace_stop"() : () -> ()
    %55 = vector.shape_cast %50 : vector<8x8xf32> to vector<1x8x8xf32>
    %56 = vector.broadcast %55 : vector<1x8x8xf32> to vector<2x8x8xf32>
    %57 = arith.addf %54, %56 : vector<2x8x8xf32>
    %cst_19 = arith.constant dense<0xFF800000> : vector<2x8xf32>
    %58 = vector.multi_reduction <maximumf>, %57, %cst_19 [2] : vector<2x8x8xf32> to vector<2x8xf32>
    %59 = vector.shape_cast %58 : vector<2x8xf32> to vector<2x8x1xf32>
    %60 = vector.broadcast %59 : vector<2x8x1xf32> to vector<2x8x8xf32>
    %61 = arith.subf %57, %60 : vector<2x8x8xf32>
    %62 = math.exp %61 : vector<2x8x8xf32>
    %cst_20 = arith.constant dense<0.000000e+00> : vector<2x8xf32>
    %63 = vector.multi_reduction <add>, %62, %cst_20 [2] : vector<2x8x8xf32> to vector<2x8xf32>
    %64 = vector.shape_cast %63 : vector<2x8xf32> to vector<2x8x1xf32>
    %65 = tpu.reciprocal %64 {approx = true} : vector<2x8x1xf32> -> vector<2x8x1xf32>
    %66 = vector.broadcast %65 : vector<2x8x1xf32> to vector<2x8x8xf32>
    %67 = arith.mulf %62, %66 : vector<2x8x8xf32>
    %68 = arith.truncf %67 : vector<2x8x8xf32> to vector<2x8x8xbf16>
    %69 = vector.extract_strided_slice %41 {offsets = [0, 0, 0], sizes = [2, 8, 16], strides = [1, 1, 1]} : vector<2x8x32xbf16> to vector<2x8x16xbf16>
    "tpu.trace_start"() <{level = 10 : i32, message = "bqk,bkd->bqd"}> : () -> ()
    %cst_21 = arith.constant dense<0.000000e+00> : vector<2x8x16xf32>
    %70 = tpu.matmul %68, %69, %cst_21 {dimension_numbers = #tpu.dot_dimension_numbers<[2], [1], [1], [2], [0, 0, 0, 1, 1, 2], [0], [0]>} : vector<2x8x8xbf16>, vector<2x8x16xbf16>, vector<2x8x16xf32> -> vector<2x8x16xf32>
    "tpu.trace_stop"() : () -> ()
    %71 = vector.shape_cast %70 : vector<2x8x16xf32> to vector<16x16xf32>
    %72 = arith.truncf %71 : vector<16x16xf32> to vector<16x16xbf16>
    %c0_22 = arith.constant 0 : index
    %c0_23 = arith.constant 0 : index
    %73 = vector.load %arg4[%c0_22, %c0_23] : memref<32x32xbf16, #tpu.memory_space<vmem>>, vector<16x32xbf16>
    %cst_24 = arith.constant dense<0.000000e+00> : vector<16x32xf32>
    %74 = tpu.matmul %72, %73, %cst_24 {dimension_numbers = #tpu.dot_dimension_numbers<[1], [0], [0], [1], [0, 0, 1, 1], [], []>} : vector<16x16xbf16>, vector<16x32xbf16>, vector<16x32xf32> -> vector<16x32xf32>
    %75 = arith.addf %51, %74 : vector<16x32xf32>
    %76 = vector.extract_strided_slice %35 {offsets = [0, 0, 16], sizes = [2, 8, 16], strides = [1, 1, 1]} : vector<2x8x32xbf16> to vector<2x8x16xbf16>
    %77 = vector.extract_strided_slice %38 {offsets = [0, 0, 16], sizes = [2, 8, 16], strides = [1, 1, 1]} : vector<2x8x32xbf16> to vector<2x8x16xbf16>
    "tpu.trace_start"() <{level = 10 : i32, message = "bqd,bkd->bqk"}> : () -> ()
    %cst_25 = arith.constant dense<0.000000e+00> : vector<2x8x8xf32>
    %78 = tpu.matmul %76, %77, %cst_25 {dimension_numbers = #tpu.dot_dimension_numbers<[2], [2], [1], [1], [0, 0, 0, 1, 1, 1], [0], [0]>} : vector<2x8x16xbf16>, vector<2x8x16xbf16>, vector<2x8x8xf32> -> vector<2x8x8xf32>
    "tpu.trace_stop"() : () -> ()
    %79 = vector.shape_cast %50 : vector<8x8xf32> to vector<1x8x8xf32>
    %80 = vector.broadcast %79 : vector<1x8x8xf32> to vector<2x8x8xf32>
    %81 = arith.addf %78, %80 : vector<2x8x8xf32>
    %cst_26 = arith.constant dense<0xFF800000> : vector<2x8xf32>
    %82 = vector.multi_reduction <maximumf>, %81, %cst_26 [2] : vector<2x8x8xf32> to vector<2x8xf32>
    %83 = vector.shape_cast %82 : vector<2x8xf32> to vector<2x8x1xf32>
    %84 = vector.broadcast %83 : vector<2x8x1xf32> to vector<2x8x8xf32>
    %85 = arith.subf %81, %84 : vector<2x8x8xf32>
    %86 = math.exp %85 : vector<2x8x8xf32>
    %cst_27 = arith.constant dense<0.000000e+00> : vector<2x8xf32>
    %87 = vector.multi_reduction <add>, %86, %cst_27 [2] : vector<2x8x8xf32> to vector<2x8xf32>
    %88 = vector.shape_cast %87 : vector<2x8xf32> to vector<2x8x1xf32>
    %89 = tpu.reciprocal %88 {approx = true} : vector<2x8x1xf32> -> vector<2x8x1xf32>
    %90 = vector.broadcast %89 : vector<2x8x1xf32> to vector<2x8x8xf32>
    %91 = arith.mulf %86, %90 : vector<2x8x8xf32>
    %92 = arith.truncf %91 : vector<2x8x8xf32> to vector<2x8x8xbf16>
    %93 = vector.extract_strided_slice %41 {offsets = [0, 0, 16], sizes = [2, 8, 16], strides = [1, 1, 1]} : vector<2x8x32xbf16> to vector<2x8x16xbf16>
    "tpu.trace_start"() <{level = 10 : i32, message = "bqk,bkd->bqd"}> : () -> ()
    %cst_28 = arith.constant dense<0.000000e+00> : vector<2x8x16xf32>
    %94 = tpu.matmul %92, %93, %cst_28 {dimension_numbers = #tpu.dot_dimension_numbers<[2], [1], [1], [2], [0, 0, 0, 1, 1, 2], [0], [0]>} : vector<2x8x8xbf16>, vector<2x8x16xbf16>, vector<2x8x16xf32> -> vector<2x8x16xf32>
    "tpu.trace_stop"() : () -> ()
    %95 = vector.shape_cast %94 : vector<2x8x16xf32> to vector<16x16xf32>
    %96 = arith.truncf %95 : vector<16x16xf32> to vector<16x16xbf16>
    %c16 = arith.constant 16 : index
    %c0_29 = arith.constant 0 : index
    %97 = vector.load %arg4[%c16, %c0_29] : memref<32x32xbf16, #tpu.memory_space<vmem>>, vector<16x32xbf16>
    %cst_30 = arith.constant dense<0.000000e+00> : vector<16x32xf32>
    %98 = tpu.matmul %96, %97, %cst_30 {dimension_numbers = #tpu.dot_dimension_numbers<[1], [0], [0], [1], [0, 0, 1, 1], [], []>} : vector<16x16xbf16>, vector<16x32xbf16>, vector<16x32xf32> -> vector<16x32xf32>
    %99 = arith.addf %75, %98 : vector<16x32xf32>
    %100 = arith.addf %2, %99 : vector<16x32xf32>
    %c0_31 = arith.constant 0 : index
    %c0_32 = arith.constant 0 : index
    %101 = vector.load %arg5[%c0_31, %c0_32] : memref<1x32xf32, #tpu.memory_space<vmem>>, vector<1x32xf32>
    %102 = vector.broadcast %101 : vector<1x32xf32> to vector<16x32xf32>
    %103 = arith.addf %100, %102 : vector<16x32xf32>
    %c0_33 = arith.constant 0 : index
    %c0_34 = arith.constant 0 : index
    %104 = vector.load %arg8[%c0_33, %c0_34] : memref<1x32xf32, #tpu.memory_space<vmem>>, vector<1x32xf32>
    %c0_35 = arith.constant 0 : index
    %c0_36 = arith.constant 0 : index
    %105 = vector.load %arg9[%c0_35, %c0_36] : memref<1x32xf32, #tpu.memory_space<vmem>>, vector<1x32xf32>
    %cst_37 = arith.constant dense<0.000000e+00> : vector<16xf32>
    %106 = vector.multi_reduction <add>, %103, %cst_37 [1] : vector<16x32xf32> to vector<16xf32>
    %107 = vector.shape_cast %106 : vector<16xf32> to vector<16x1xf32>
    %cst_38 = arith.constant 3.200000e+01 : f32
    %108 = vector.broadcast %cst_38 : f32 to vector<16x1xf32>
    %109 = arith.divf %107, %108 : vector<16x1xf32>
    %110 = vector.broadcast %109 : vector<16x1xf32> to vector<16x32xf32>
    %111 = arith.subf %103, %110 : vector<16x32xf32>
    %112 = arith.mulf %111, %111 : vector<16x32xf32>
    %cst_39 = arith.constant dense<0.000000e+00> : vector<16xf32>
    %113 = vector.multi_reduction <add>, %112, %cst_39 [1] : vector<16x32xf32> to vector<16xf32>
    %114 = vector.shape_cast %113 : vector<16xf32> to vector<16x1xf32>
    %cst_40 = arith.constant 3.200000e+01 : f32
    %115 = vector.broadcast %cst_40 : f32 to vector<16x1xf32>
    %116 = arith.divf %114, %115 : vector<16x1xf32>
    %117 = vector.broadcast %109 : vector<16x1xf32> to vector<16x32xf32>
    %118 = arith.subf %103, %117 : vector<16x32xf32>
    %cst_41 = arith.constant 9.99999974E-6 : f32
    %119 = vector.broadcast %cst_41 : f32 to vector<16x1xf32>
    %120 = arith.addf %116, %119 : vector<16x1xf32>
    %121 = math.rsqrt %120 : vector<16x1xf32>
    %122 = vector.broadcast %121 : vector<16x1xf32> to vector<16x32xf32>
    %123 = arith.mulf %118, %122 : vector<16x32xf32>
    %124 = vector.broadcast %104 : vector<1x32xf32> to vector<16x32xf32>
    %125 = arith.mulf %123, %124 : vector<16x32xf32>
    %126 = vector.broadcast %105 : vector<1x32xf32> to vector<16x32xf32>
    %127 = arith.addf %125, %126 : vector<16x32xf32>
    %128 = arith.truncf %127 : vector<16x32xf32> to vector<16x32xbf16>
    %c0_42 = arith.constant 0 : index
    %c0_43 = arith.constant 0 : index
    %129 = vector.load %arg10[%c0_42, %c0_43] : memref<32x128xbf16, #tpu.memory_space<vmem>>, vector<32x128xbf16>
    %cst_44 = arith.constant dense<0.000000e+00> : vector<16x128xf32>
    %130 = tpu.matmul %128, %129, %cst_44 {dimension_numbers = #tpu.dot_dimension_numbers<[1], [0], [0], [1], [0, 0, 1, 1], [], []>} : vector<16x32xbf16>, vector<32x128xbf16>, vector<16x128xf32> -> vector<16x128xf32>
    %c0_45 = arith.constant 0 : index
    %c0_46 = arith.constant 0 : index
    %131 = vector.load %arg11[%c0_45, %c0_46] : memref<1x128xf32, #tpu.memory_space<vmem>>, vector<1x128xf32>
    %132 = vector.broadcast %131 : vector<1x128xf32> to vector<16x128xf32>
    %133 = arith.addf %130, %132 : vector<16x128xf32>
    %cst_47 = arith.constant 1.702000e+00 : f32
    %134 = vector.broadcast %cst_47 : f32 to vector<16x128xf32>
    %135 = arith.mulf %134, %133 : vector<16x128xf32>
    %136 = arith.negf %135 : vector<16x128xf32>
    %137 = math.exp %136 : vector<16x128xf32>
    %cst_48 = arith.constant 1.000000e+00 : f32
    %138 = vector.broadcast %cst_48 : f32 to vector<16x128xf32>
    %139 = arith.addf %138, %137 : vector<16x128xf32>
    %140 = arith.divf %138, %139 : vector<16x128xf32>
    %141 = arith.mulf %133, %140 : vector<16x128xf32>
    %142 = arith.truncf %141 : vector<16x128xf32> to vector<16x128xbf16>
    %c0_49 = arith.constant 0 : index
    %c0_50 = arith.constant 0 : index
    %143 = vector.load %arg12[%c0_49, %c0_50] : memref<128x32xbf16, #tpu.memory_space<vmem>>, vector<128x32xbf16>
    %cst_51 = arith.constant dense<0.000000e+00> : vector<16x32xf32>
    %144 = tpu.matmul %142, %143, %cst_51 {dimension_numbers = #tpu.dot_dimension_numbers<[1], [0], [0], [1], [0, 0, 1, 1], [], []>} : vector<16x128xbf16>, vector<128x32xbf16>, vector<16x32xf32> -> vector<16x32xf32>
    %c0_52 = arith.constant 0 : index
    %c0_53 = arith.constant 0 : index
    %145 = vector.load %arg13[%c0_52, %c0_53] : memref<1x32xf32, #tpu.memory_space<vmem>>, vector<1x32xf32>
    %146 = vector.broadcast %145 : vector<1x32xf32> to vector<16x32xf32>
    %147 = arith.addf %144, %146 : vector<16x32xf32>
    %148 = arith.addf %103, %147 : vector<16x32xf32>
    %149 = vector.shape_cast %148 : vector<16x32xf32> to vector<2x8x32xf32>
    %150 = arith.truncf %149 : vector<2x8x32xf32> to vector<2x8x32xbf16>
    %c0_54 = arith.constant 0 : index
    %c0_55 = arith.constant 0 : index
    %c0_56 = arith.constant 0 : index
    %151 = vector.load %arg14[%c0_54, %c0_55, %c0_56] : memref<2x8x32xbf16, #tpu.memory_space<vmem>>, vector<2x8x32xbf16>
    tpu.vector_store %arg14[%c0_54, %c0_55, %c0_56], %150 {strides = array<i32>} : memref<2x8x32xbf16, #tpu.memory_space<vmem>>, vector<2x8x32xbf16>,
    return
  }
  func.func @transform_0(%arg0: i32) -> (i32, i32, i32) {
    %c0_i32 = arith.constant 0 : i32
    %c0_i32_0 = arith.constant 0 : i32
    %c0_i32_1 = arith.constant 0 : i32
    return %arg0, %c0_i32, %c0_i32_0 : i32, i32, i32
  }
  func.func @transform_1(%arg0: i32) -> (i32, i32) {
    %c0_i32 = arith.constant 0 : i32
    %c0_i32_0 = arith.constant 0 : i32
    %c0_i32_1 = arith.constant 0 : i32
    return %c0_i32, %c0_i32_0 : i32, i32
  }
  func.func @transform_2(%arg0: i32) -> (i32, i32) {
    %c0_i32 = arith.constant 0 : i32
    %c0_i32_0 = arith.constant 0 : i32
    %c0_i32_1 = arith.constant 0 : i32
    return %c0_i32, %c0_i32_0 : i32, i32
  }
  func.func @transform_3(%arg0: i32) -> (i32, i32) {
    %c0_i32 = arith.constant 0 : i32
    %c0_i32_0 = arith.constant 0 : i32
    %c0_i32_1 = arith.constant 0 : i32
    return %c0_i32, %c0_i32_0 : i32, i32
  }
  func.func @transform_4(%arg0: i32) -> (i32, i32) {
    %c0_i32 = arith.constant 0 : i32
    %c0_i32_0 = arith.constant 0 : i32
    %c0_i32_1 = arith.constant 0 : i32
    return %c0_i32, %c0_i32_0 : i32, i32
  }
  func.func @transform_5(%arg0: i32) -> (i32, i32) {
    %c0_i32 = arith.constant 0 : i32
    %c0_i32_0 = arith.constant 0 : i32
    %c0_i32_1 = arith.constant 0 : i32
    return %c0_i32, %c0_i32_0 : i32, i32
  }
  func.func @transform_6(%arg0: i32) -> (i32, i32) {
    %c0_i32 = arith.constant 0 : i32
    %c0_i32_0 = arith.constant 0 : i32
    %c0_i32_1 = arith.constant 0 : i32
    return %c0_i32, %c0_i32_0 : i32, i32
  }
  func.func @transform_7(%arg0: i32) -> (i32, i32) {
    %c0_i32 = arith.constant 0 : i32
    %c0_i32_0 = arith.constant 0 : i32
    %c0_i32_1 = arith.constant 0 : i32
    return %c0_i32, %c0_i32_0 : i32, i32
  }
  func.func @transform_8(%arg0: i32) -> (i32, i32) {
    %c0_i32 = arith.constant 0 : i32
    %c0_i32_0 = arith.constant 0 : i32
    %c0_i32_1 = arith.constant 0 : i32
    return %c0_i32, %c0_i32_0 : i32, i32
  }
  func.func @transform_9(%arg0: i32) -> (i32, i32) {
    %c0_i32 = arith.constant 0 : i32
    %c0_i32_0 = arith.constant 0 : i32
    %c0_i32_1 = arith.constant 0 : i32
    return %c0_i32, %c0_i32_0 : i32, i32
  }
  func.func @transform_10(%arg0: i32) -> (i32, i32) {
    %c0_i32 = arith.constant 0 : i32
    %c0_i32_0 = arith.constant 0 : i32
    %c0_i32_1 = arith.constant 0 : i32
    return %c0_i32, %c0_i32_0 : i32, i32
  }
  func.func @transform_11(%arg0: i32) -> (i32, i32) {
    %c0_i32 = arith.constant 0 : i32
    %c0_i32_0 = arith.constant 0 : i32
    %c0_i32_1 = arith.constant 0 : i32
    return %c0_i32, %c0_i32_0 : i32, i32
  }
  func.func @transform_12(%arg0: i32) -> (i32, i32) {
    %c0_i32 = arith.constant 0 : i32
    %c0_i32_0 = arith.constant 0 : i32
    %c0_i32_1 = arith.constant 0 : i32
    return %c0_i32, %c0_i32_0 : i32, i32
  }
  func.func @transform_13(%arg0: i32) -> (i32, i32, i32) {
    %c0_i32 = arith.constant 0 : i32
    %c0_i32_0 = arith.constant 0 : i32
    %c0_i32_1 = arith.constant 0 : i32
    return %arg0, %c0_i32, %c0_i32_0 : i32, i32, i32
  }
}

module attributes {stable_mosaic.version = 11 : i64} {
  func.func @_final_kernel(%arg0: memref<2x32xbf16, #tpu.memory_space<vmem>>, %arg1: memref<1x32xf32, #tpu.memory_space<vmem>>, %arg2: memref<1x32xf32, #tpu.memory_space<vmem>>, %arg3: memref<32x16xbf16, #tpu.memory_space<vmem>>, %arg4: memref<2x16xf32, #tpu.memory_space<vmem>>) attributes {dimension_semantics = [], scalar_prefetch = 0 : i64, scratch_operands = 0 : i64, tpu.core_type = #tpu.core_type<tc>} {
    %c0 = arith.constant 0 : index
    %c0_0 = arith.constant 0 : index
    %0 = vector.load %arg0[%c0, %c0_0] : memref<2x32xbf16, #tpu.memory_space<vmem>>, vector<2x32xbf16>
    %c0_1 = arith.constant 0 : index
    %c0_2 = arith.constant 0 : index
    %1 = vector.load %arg1[%c0_1, %c0_2] : memref<1x32xf32, #tpu.memory_space<vmem>>, vector<1x32xf32>
    %c0_3 = arith.constant 0 : index
    %c0_4 = arith.constant 0 : index
    %2 = vector.load %arg2[%c0_3, %c0_4] : memref<1x32xf32, #tpu.memory_space<vmem>>, vector<1x32xf32>
    %3 = arith.extf %0 : vector<2x32xbf16> to vector<2x32xf32>
    %cst = arith.constant dense<0.000000e+00> : vector<2xf32>
    %4 = vector.multi_reduction <add>, %3, %cst [1] : vector<2x32xf32> to vector<2xf32>
    %5 = vector.shape_cast %4 : vector<2xf32> to vector<2x1xf32>
    %cst_5 = arith.constant 3.200000e+01 : f32
    %6 = vector.broadcast %cst_5 : f32 to vector<2x1xf32>
    %7 = arith.divf %5, %6 : vector<2x1xf32>
    %8 = vector.broadcast %7 : vector<2x1xf32> to vector<2x32xf32>
    %9 = arith.subf %3, %8 : vector<2x32xf32>
    %10 = arith.mulf %9, %9 : vector<2x32xf32>
    %cst_6 = arith.constant dense<0.000000e+00> : vector<2xf32>
    %11 = vector.multi_reduction <add>, %10, %cst_6 [1] : vector<2x32xf32> to vector<2xf32>
    %12 = vector.shape_cast %11 : vector<2xf32> to vector<2x1xf32>
    %cst_7 = arith.constant 3.200000e+01 : f32
    %13 = vector.broadcast %cst_7 : f32 to vector<2x1xf32>
    %14 = arith.divf %12, %13 : vector<2x1xf32>
    %15 = vector.broadcast %7 : vector<2x1xf32> to vector<2x32xf32>
    %16 = arith.subf %3, %15 : vector<2x32xf32>
    %cst_8 = arith.constant 9.99999974E-6 : f32
    %17 = vector.broadcast %cst_8 : f32 to vector<2x1xf32>
    %18 = arith.addf %14, %17 : vector<2x1xf32>
    %19 = math.rsqrt %18 : vector<2x1xf32>
    %20 = vector.broadcast %19 : vector<2x1xf32> to vector<2x32xf32>
    %21 = arith.mulf %16, %20 : vector<2x32xf32>
    %22 = vector.broadcast %1 : vector<1x32xf32> to vector<2x32xf32>
    %23 = arith.mulf %21, %22 : vector<2x32xf32>
    %24 = vector.broadcast %2 : vector<1x32xf32> to vector<2x32xf32>
    %25 = arith.addf %23, %24 : vector<2x32xf32>
    %26 = arith.truncf %25 : vector<2x32xf32> to vector<2x32xbf16>
    %c0_9 = arith.constant 0 : index
    %c0_10 = arith.constant 0 : index
    %27 = vector.load %arg3[%c0_9, %c0_10] : memref<32x16xbf16, #tpu.memory_space<vmem>>, vector<32x16xbf16>
    %cst_11 = arith.constant dense<0.000000e+00> : vector<2x16xf32>
    %28 = tpu.matmul %26, %27, %cst_11 {dimension_numbers = #tpu.dot_dimension_numbers<[1], [0], [0], [1], [0, 0, 1, 1], [], []>} : vector<2x32xbf16>, vector<32x16xbf16>, vector<2x16xf32> -> vector<2x16xf32>
    %c0_12 = arith.constant 0 : index
    %c0_13 = arith.constant 0 : index
    %29 = vector.load %arg4[%c0_12, %c0_13] : memref<2x16xf32, #tpu.memory_space<vmem>>, vector<2x16xf32>
    tpu.vector_store %arg4[%c0_12, %c0_13], %28 {strides = array<i32>} : memref<2x16xf32, #tpu.memory_space<vmem>>, vector<2x16xf32>,
    return
  }
}

</mosaic_0001>

<bundles_post_ra>
// kernel: vit_text_forward.5
= control target key start
LH: loop header
LB: loop body
LE: loop exit
PB: predicated region body
PF: predicated region fallthrough
CT: control target
= control target key end

     0   :  { %vm23_vm0 = vcmask 254976   ;;  %s220_s0 = inlined_call_operand.vmem [shape: bf16[2,32], index: 0, kind: input, shape index: {}]   ;;  %s221_s1 = inlined_call_operand.vmem [shape: f32[1,32], index: 1, kind: input, shape index: {}]   ;;  %s222_s2 = inlined_call_operand.vmem [shape: f32[1,32], index: 2, kind: input, shape index: {}]   ;;  %s223_s3 = inlined_call_operand.vmem [shape: bf16[32,16], index: 3, kind: input, shape index: {}]   ;;  %s224_s4 = inlined_call_operand.hbm [shape: f32[2,16], index: 4, kind: output, shape index: {}]  }
   0x1   :  { %v19_v0 = vld [vmem:[%s220_s0] sm:$0x1] }
   0x2   :  { %v22_v1 = vunpack.c.l.bf16 %v19_v0 }
   0x3   :  { %9 = vsyncpa [#allocation3], 0  ;;  %v148_v8 = vld [vmem:[%s223_s3 + $0x8] sm:$0xff]   ;;  %v174_v9 = vmov 0.0   ;;  %vm175_vm1 = vmmov 0   ;;  %v149_v10 = vld [vmem:[%s223_s3] sm:$0xff]  }
   0x4   :  { %v24_v2 = vsel %vm23_vm0, %v22_v1, 0.0  ;;  %137 = vmatprep.subr.bf16.mxu0 %v174_v9  ;;  %141 = vmatprep.mubr.msk.bf16.mxu0 %vm175_vm1, %v174_v9  ;;  %v129_v15 = vld [vmem:[%s221_s1] ss:$0 sm:$0xff]  ;;  %vm69_vm2 = vcmask 261120   ;;  %s176_s3 = smov [#allocation2]   ;;  %vm113_vm3 = vcmask 123904  }
   0x5   :  { %25 = vadd.xlane.f32.xlu0 %v24_v2  ;;  %138 = vmatpush3.bf16.msra.mxu0 %v148_v8  ;;  %v130_v17 = vld [vmem:[%s222_s2] ss:$0 sm:$0xff]  ;;  %s121_s24 = sshll.u32 %s176_s3, 4  ;;  %s122_s24 = int_to_ptr.vmem [resolvable:$true] %s121_s24 }
   0x6   :  { %139 = vmatprep.subr.bf16.mxu0 %v174_v9  ;;  %s152_s25 = scalar_lea.vmem %s122_s24, 32  ;;  %p157_p1 = scmp.lt.s32.totalorder %s122_s24, %s122_s24 }
   0x7   :  { %p153_p0 = scmp.ne.s32.totalorder %s122_s24, %s152_s25  ;;  %p158_p2 = scmp.lt.s32.totalorder %s152_s25, %s152_s25 }
   0x9   :  { %140 = vmatpush3.bf16.msra.mxu0 %v149_v10  ;;  %p159_p3 = por %p158_p2, %p157_p1 }
   0xb   :  { %p160_p4 = pnand %p159_p3, %p153_p0 }
  0x8e   :  { %v26_v3 = vpop.xlane.xlu0 %25 }
  0x8f   :  { %v28_v4 = vmul.f32 0.03125, %v26_v3 }
  0x91   :  { %v29_v5 = vsub.f32 %v22_v1, %v28_v4 }
  0x93   :  { %v30_v6 = vmul.f32 %v29_v5, %v29_v5 }
  0x95   :  { %v31_v7 = vsel %vm23_vm0, %v30_v6, 0.0 }
  0x96   :  { %32 = vadd.xlane.f32.xlu0 %v31_v7 }
 0x11f   :  { %v33_v11 = vpop.xlane.xlu0 %32 }
 0x120   :  { %v34_v12 = vmul.f32 0.03125, %v33_v11 }
 0x122   :  { %v35_v13 = vadd.f32 1e-05, %v34_v12 }
 0x124   :  { %150 = vrsqrt.f32 %v35_v13 }
 0x131   :  { %v151_v14 = vpop.eup %150 }
 0x132   :  { %v37_v16 = vmul.f32 %v151_v14, %v29_v5 }
 0x134   :  { %v44_v18 = vmul.f32 %v129_v15, %v37_v16 }
 0x136   :  { %v51_v19 = vadd.f32 %v130_v17, %v44_v18 }
 0x138   :  { %v52_v20 = vpack.c.bf16 %v51_v19, %v51_v19 }
 0x13a   :  { %142 = vmatmul.mubr.msk.bf16.vlgmr.msra.gmra.mxu0 %vm69_vm2, %v52_v20 }
 0x1fa   :  { %v107_v21 = vpop.f32.mrf.mxu0 }
 0x1fb   :  { %114 = vst.msk [vmem:[#allocation2] sm:$0x3] %vm113_vm3, %v107_v21 }
 0x1fc   :  { %v143_v22 = vpop.f32.mrf.mxu0 }
 0x1fd   :  { %163 = shalt.err (!%p160_p4)
}
 0x1fe   :  { %124 = dma.vmem_to_hbm [thread:$0]  %s122_s24, 32, %s224_s4, [#allocation3]   ;;  %v110_v23 = vpop.f32.mrf.mxu0 }
 0x200   :  { %v144_v24 = vpop.f32.mrf.mxu0 }
 0x201   :  { %172 = dma.done.wait [#allocation3], 32  }
 0x202   :  { %173 = vsyncadd [#allocation3], 4294967264 }
 0x203   :  { %128 = vsyncpa [#allocation3], 1 }

// kernel: vit_text_forward.3
= control target key start
LH: loop header
LB: loop body
LE: loop exit
PB: predicated region body
PF: predicated region fallthrough
CT: control target
= control target key end

     0   :  { %vm51_vm0 = vcmask 261120   ;;  %v1213_v15 = vmov 0.0   ;;  %vm1214_vm1 = vmmov 0   ;;  %vm179_vm2 = vcmask 130048   ;;  %s1218_s18 = smov 112   ;;  %s1219_s19 = smov 48   ;;  %s1498_s0 = inlined_call_operand.vmem [shape: bf16[2,8,32], index: 0, kind: input, shape index: {}]   ;;  %s1499_s1 = inlined_call_operand.vmem [shape: bf16[32,96], index: 1, kind: input, shape index: {}]   ;;  %s1500_s5 = inlined_call_operand.vmem [shape: f32[1,32], index: 5, kind: input, shape index: {}]   ;;  %s1501_s6 = inlined_call_operand.vmem [shape: f32[1,32], index: 6, kind: input, shape index: {}]   ;;  %s1502_s2 = inlined_call_operand.vmem [shape: f32[1,96], index: 2, kind: input, shape index: {}]   ;;  %s1503_s3 = inlined_call_operand.vmem [shape: bf16[32,32], index: 3, kind: input, shape index: {}]   ;;  %s1504_s4 = inlined_call_operand.vmem [shape: f32[1,32], index: 4, kind: input, shape index: {}]   ;;  %s1505_s9 = inlined_call_operand.vmem [shape: bf16[32,128], index: 9, kind: input, shape index: {}]   ;;  %s1506_s7 = inlined_call_operand.vmem [shape: f32[1,32], index: 7, kind: input, shape index: {}]   ;;  %s1507_s8 = inlined_call_operand.vmem [shape: f32[1,32], index: 8, kind: input, shape index: {}]   ;;  %s1508_s11 = inlined_call_operand.vmem [shape: bf16[128,32], index: 11, kind: input, shape index: {}]   ;;  %s1509_s10 = inlined_call_operand.vmem [shape: f32[1,128], index: 10, kind: input, shape index: {}]   ;;  %s1510_s12 = inlined_call_operand.vmem [shape: f32[1,32], index: 12, kind: input, shape index: {}]   ;;  %s1511_s13 = inlined_call_operand.vmem [shape: bf16[2,8,32], index: 13, kind: output, shape index: {}]  }
   0x1   :  { %v1026_v0 = vld [vmem:[%s1498_s0] sm:$0xff]   ;;  %1064 = vmatprep.subr.bf16.mxu1 %v1213_v15  ;;  %v1167_v16 = vld [vmem:[%s1499_s1 + $0x8] sm:$0xff]   ;;  %1068 = vmatprep.mubr.msk.bf16.mxu1 %vm1214_vm1, %v1213_v15  ;;  %v169_v48 = vlaneseq  ;;  %vm274_vm6 = vcmask 64512   ;;  %vm304_vm7 = vcmask 1043456   ;;  %vm978_vm8 = vcmask 257024  }
   0x2   :  { %v1293_v1 = vunpack.c.l.bf16 %v1026_v0  ;;  %v1295_v2 = vunpack.c.h.bf16 %v1026_v0  ;;  %1090 = vmatprep.subr.bf16.mxu0 %v1213_v15  ;;  %1092 = vmatprep.mubr.msk.bf16.mxu0 %vm1214_vm1, %v1213_v15  ;;  %v1168_v17 = vld [vmem:[%s1499_s1] sm:$0xff]  }
   0x3   :  { %1065 = vmatpush3.bf16.msra.mxu1 %v1167_v16  ;;  %v985_v26 = vld [vmem:[%s1500_s5] ss:$0 sm:$0xff]  ;;  %s1215_s5 = smov 96   ;;  %v170_v49 = vshrl.u32 %v169_v48, 7  ;;  %v172_v50 = vand.u32 127, %v169_v48 }
   0x4   :  { %v52_v3 = vsel %vm51_vm0, %v1293_v1, 0.0  ;;  %v55_v4 = vsel %vm51_vm0, %v1295_v2, 0.0  ;;  %1066 = vmatprep.subr.bf16.mxu1 %v1213_v15  ;;  %v986_v30 = vld [vmem:[%s1501_s6] ss:$0 sm:$0xff]  ;;  %s1217_s6 = smov 80  }
   0x5   :  { %53 = vadd.xlane.f32.xlu0 %v52_v3  ;;  %v987_v35 = vld [vmem:[%s1502_s2] ss:$0 sm:$0xff]  ;;  %vm173_vm3 = vcmp.gt.s32.totalorder %v172_v50, %v170_v49  ;;  %vm174_vm4 = vcmp.ge.s32.totalorder %v172_v50, 8  ;;  %s1216_s2 = smov 64  }
   0x6   :  { %vm175_vm5 = vmor %vm173_vm3, %vm174_vm4 }
   0x7   :  { %1067 = vmatpush3.bf16.msra.mxu1 %v1168_v17  ;;  %v1350_v51 = vsel %vm175_vm5, -1e+30, %v1213_v15 }
   0x8   :  { %1072 = vmatprep.subr.bf16.mxu1 %v1213_v15 }
   0x9   :  { %56 = vadd.xlane.f32.xlu0 %v55_v4 }
  0x8e   :  { %v54_v5 = vpop.xlane.xlu0 %53 }
  0x8f   :  { %v59_v6 = vmul.f32 0.03125, %v54_v5 }
  0x91   :  { %v61_v7 = vsub.f32 %v1293_v1, %v59_v6 }
  0x92   :  { %v57_v8 = vpop.xlane.xlu0 %56 }
  0x93   :  { %v60_v9 = vmul.f32 0.03125, %v57_v8  ;;  %v63_v10 = vmul.f32 %v61_v7, %v61_v7 }
  0x95   :  { %v62_v11 = vsub.f32 %v1295_v2, %v60_v9  ;;  %v65_v12 = vsel %vm51_vm0, %v63_v10, 0.0 }
  0x96   :  { %66 = vadd.xlane.f32.xlu1 %v65_v12 }
  0x97   :  { %v64_v13 = vmul.f32 %v62_v11, %v62_v11 }
  0x99   :  { %v68_v14 = vsel %vm51_vm0, %v64_v13, 0.0 }
  0x9a   :  { %69 = vadd.xlane.f32.xlu1 %v68_v14 }
 0x11f   :  { %v67_v18 = vpop.xlane.xlu1 %66 }
 0x120   :  { %v71_v19 = vmul.f32 0.03125, %v67_v18 }
 0x122   :  { %v73_v20 = vadd.f32 1e-05, %v71_v19 }
 0x123   :  { %v70_v21 = vpop.xlane.xlu1 %69 }
 0x124   :  { %1181 = vrsqrt.f32 %v73_v20  ;;  %v72_v22 = vmul.f32 0.03125, %v70_v21 }
 0x126   :  { %v74_v23 = vadd.f32 1e-05, %v72_v22 }
 0x128   :  { %1183 = vrsqrt.f32 %v74_v23 }
 0x131   :  { %v1182_v24 = vpop.eup %1181 }
 0x132   :  { %v77_v25 = vmul.f32 %v1182_v24, %v61_v7 }
 0x134   :  { %v85_v29 = vmul.f32 %v985_v26, %v77_v25 }
 0x135   :  { %v1184_v27 = vpop.eup %1183 }
 0x136   :  { %v78_v28 = vmul.f32 %v1184_v27, %v62_v11  ;;  %v93_v32 = vadd.f32 %v986_v30, %v85_v29 }
 0x138   :  { %v86_v31 = vmul.f32 %v985_v26, %v78_v28 }
 0x13a   :  { %v94_v33 = vadd.f32 %v986_v30, %v86_v31 }
 0x13c   :  { %v95_v34 = vpack.c.bf16 %v94_v33, %v93_v32 }
 0x13e   :  { %1069 = vmatmul.mubr.msk.bf16.vlgmr.msra.gmra.mxu1 %vm51_vm0, %v95_v34 }
 0x13f   :  { %1074 = vmatprep.mubr.msk.bf16.mxu1 %vm1214_vm1, %v1213_v15 }
 0x1fe   :  { %v156_v36 = vpop.f32.mrf.mxu1 }
 0x1ff   :  { %v157_v37 = vadd.f32 %v987_v35, %v156_v36 }
 0x200   :  { %v1070_v38 = vpop.f32.mrf.mxu1 }
 0x201   :  { %v1331_v39 = vpack.c.bf16 %v157_v37, %v157_v37 }
 0x202   :  { %v159_v40 = vpop.f32.mrf.mxu1 }
 0x203   :  { %v160_v41 = vadd.f32 %v987_v35, %v159_v40  ;;  %177 = vrot.lane.b32.xlu0 %v1331_v39, %s1215_s5 }
 0x204   :  { %v1071_v42 = vpop.f32.mrf.mxu1 }
 0x205   :  { %v1334_v43 = vpack.c.bf16 %v160_v41, %v160_v41 }
 0x207   :  { %226 = vrot.lane.b32.xlu1 %v1334_v43, %s1215_s5 }
 0x275   :  { %v178_v44 = vpop.permute.xlu0 %177 }
 0x276   :  { %v184_v45 = vsel %vm179_vm2, %v178_v44, 0 }
 0x277   :  { %1073 = vmatpush3.bf16.xpose.msra.mxu1 %v184_v45 }
 0x278   :  { %1078 = vmatprep.subr.bf16.mxu1 %v1213_v15 }
 0x279   :  { %v227_v46 = vpop.permute.xlu1 %226 }
 0x27a   :  { %v232_v47 = vsel %vm179_vm2, %v227_v46, 0 }
 0x27e   :  { %1075 = vmatmul.mubr.msk.bf16.vlgmr.msra.gmra.mxu1 %vm179_vm2, %v1331_v39 }
 0x27f   :  { %1079 = vmatpush3.bf16.xpose.msra.mxu1 %v232_v47  ;;  %1080 = vmatprep.mubr.msk.bf16.mxu1 %vm1214_vm1, %v1213_v15 }
 0x280   :  { %1084 = vmatprep.subr.bf16.mxu1 %v1213_v15 }
 0x286   :  { %1081 = vmatmul.mubr.msk.bf16.vlgmr.msra.gmra.mxu1 %vm179_vm2, %v1334_v43 }
 0x287   :  { %1086 = vmatprep.mubr.msk.bf16.mxu1 %vm1214_vm1, %v1213_v15 }
 0x33e   :  { %v220_v52 = vpop.f32.mrf.mxu1 }
 0x33f   :  { %v221_v53 = vadd.f32 %v220_v52, %v1350_v51 }
 0x340   :  { %v1076_v54 = vpop.f32.mrf.mxu1 }
 0x341   :  { %v275_v55 = vsel %vm274_vm6, %v221_v53, -inf }
 0x342   :  { %276 = vmax.xlane.f32.xlu1 %v275_v55  ;;  %v223_v56 = vpop.f32.mrf.mxu1 }
 0x344   :  { %v1077_v57 = vpop.f32.mrf.mxu1 }
 0x346   :  { %v268_v58 = vpop.f32.mrf.mxu1 }
 0x347   :  { %v269_v59 = vadd.f32 %v268_v58, %v1350_v51 }
 0x348   :  { %v1082_v60 = vpop.f32.mrf.mxu1 }
 0x349   :  { %v278_v61 = vsel %vm274_vm6, %v269_v59, -inf }
 0x34a   :  { %279 = vmax.xlane.f32.xlu0 %v278_v61  ;;  %v271_v62 = vpop.f32.mrf.mxu1 }
 0x34c   :  { %v1083_v63 = vpop.f32.mrf.mxu1 }
 0x353   :  { %348 = vrot.lane.b32.xlu1 %v1334_v43, %s1216_s2 }
 0x357   :  { %401 = vrot.lane.b32.xlu1 %v1331_v39, %s1217_s6 }
 0x3cb   :  { %v277_v0 = vpop.xlane.xlu1 %276 }
 0x3cc   :  { %v281_v3 = vsub.f32 %v221_v53, %v277_v0 }
 0x3ce   :  { %v283_v4 = vmul.f32 1.442695, %v281_v3 }
 0x3cf   :  { %v349_v5 = vpop.permute.xlu1 %348 }
 0x3d0   :  { %1185 = vpow2.f32 %v283_v4  ;;  %v354_v6 = vsel %vm304_vm7, %v349_v5, 0 }
 0x3d1   :  { %1091 = vmatpush3.bf16.msra.mxu0 %v354_v6 }
 0x3d2   :  { %1102 = vmatprep.subr.bf16.mxu0 %v1213_v15 }
 0x3d3   :  { %v280_v7 = vpop.xlane.xlu0 %279  ;;  %v402_v16 = vpop.permute.xlu1 %401 }
 0x3d4   :  { %v282_v8 = vsub.f32 %v269_v59, %v280_v7  ;;  %v407_v23 = vsel %vm179_vm2, %v402_v16, 0 }
 0x3d6   :  { %v285_v9 = vmul.f32 1.442695, %v282_v8 }
 0x3d8   :  { %1187 = vpow2.f32 %v285_v9 }
 0x3dd   :  { %v1186_v10 = vpop.eup %1185 }
 0x3de   :  { %v287_v11 = vsel %vm274_vm6, %v1186_v10, 0.0 }
 0x3df   :  { %288 = vadd.xlane.f32.xlu0 %v287_v11  ;;  %v1169_v11 = vld [vmem:[%s1503_s3] sm:$0xff]  }
 0x3e5   :  { %v1188_v12 = vpop.eup %1187 }
 0x3e6   :  { %v290_v13 = vsel %vm274_vm6, %v1188_v12, 0.0 }
 0x3e7   :  { %291 = vadd.xlane.f32.xlu1 %v290_v13  ;;  %v1170_v13 = vld [vmem:[%s1503_s3 + $0x8] sm:$0xff]  }
 0x3f5   :  { %299 = vrot.lane.b32.xlu0 %v1331_v39, %s1216_s2 }
 0x3f8   :  { %451 = vrot.lane.b32.xlu1 %v1334_v43, %s1217_s6 }
 0x3f9   :  { %399 = vrot.lane.b32.xlu0 %v1331_v39, %s1218_s18 }
 0x3fc   :  { %449 = vrot.lane.b32.xlu1 %v1334_v43, %s1218_s18 }
 0x468   :  { %v289_v14 = vpop.xlane.xlu0 %288 }
 0x469   :  { %1189 = vrcp.f32 %v289_v14 }
 0x46c   :  { %v300_v17 = vpop.permute.xlu0 %299 }
 0x46d   :  { %v306_v18 = vsel %vm304_vm7, %v300_v17, 0 }
 0x46e   :  { %1085 = vmatpush3.bf16.msra.mxu1 %v306_v18 }
 0x46f   :  { %1096 = vmatprep.subr.bf16.mxu1 %v1213_v15 }
 0x470   :  { %v292_v19 = vpop.xlane.xlu1 %291  ;;  %v400_v28 = vpop.permute.xlu0 %399 }
 0x471   :  { %1191 = vrcp.f32 %v292_v19 }
 0x474   :  { %v452_v26 = vpop.permute.xlu1 %451 }
 0x475   :  { %v457_v29 = vsel %vm179_vm2, %v452_v26, 0 }
 0x476   :  { %v1190_v20 = vpop.eup %1189 }
 0x477   :  { %v295_v21 = vmul.f32 %v1190_v20, %v1186_v10 }
 0x478   :  { %v450_v30 = vpop.permute.xlu1 %449 }
 0x479   :  { %v297_v22 = vpack.c.bf16 %v295_v21, %v295_v21 }
 0x47b   :  { %1087 = vmatmul.mubr.msk.bf16.vlgmr.msra.gmra.mxu1 %vm274_vm6, %v297_v22 }
 0x47c   :  { %1097 = vmatpush3.bf16.xpose.msra.mxu1 %v407_v23  ;;  %1098 = vmatprep.mubr.msk.bf16.mxu1 %vm1214_vm1, %v1213_v15 }
 0x47d   :  { %1108 = vmatprep.subr.bf16.mxu1 %v1213_v15 }
 0x47e   :  { %v1192_v24 = vpop.eup %1191 }
 0x47f   :  { %v296_v25 = vmul.f32 %v1192_v24, %v1188_v12 }
 0x481   :  { %v298_v27 = vpack.c.bf16 %v296_v25, %v296_v25 }
 0x483   :  { %1093 = vmatmul.mubr.msk.bf16.vlgmr.msra.gmra.mxu0 %vm274_vm6, %v298_v27  ;;  %1099 = vmatmul.mubr.msk.bf16.vlgmr.msra.gmra.mxu1 %vm179_vm2, %v400_v28 }
 0x484   :  { %1103 = vmatpush3.bf16.xpose.msra.mxu0 %v457_v29  ;;  %1104 = vmatprep.mubr.msk.bf16.mxu0 %vm1214_vm1, %v1213_v15 }
 0x485   :  { %1114 = vmatprep.subr.bf16.mxu0 %v1213_v15  ;;  %1110 = vmatprep.mubr.msk.bf16.mxu1 %vm1214_vm1, %v1213_v15 }
 0x48b   :  { %1105 = vmatmul.mubr.msk.bf16.vlgmr.msra.gmra.mxu0 %vm179_vm2, %v450_v30  ;;  %v1005_v30 = vld [vmem:[%s1504_s4] ss:$0 sm:$0xff] }
 0x48c   :  { %1116 = vmatprep.mubr.msk.bf16.mxu0 %vm1214_vm1, %v1213_v15 }
 0x53b   :  { %v1384_v31 = vpop.f32.mrf.mxu1 }
 0x53d   :  { %v1088_v32 = vpop.f32.mrf.mxu1 }
 0x53f   :  { %v345_v33 = vpop.f32.mrf.mxu1 }
 0x541   :  { %v1089_v34 = vpop.f32.mrf.mxu1 }
 0x543   :  { %v1386_v35 = vpop.f32.mrf.mxu0  ;;  %v443_v36 = vpop.f32.mrf.mxu1 }
 0x544   :  { %v396_v37 = vpack.c.bf16 %v1386_v35, %v1384_v31  ;;  %v444_v38 = vadd.f32 %v443_v36, %v1350_v51 }
 0x545   :  { %v1094_v40 = vpop.f32.mrf.mxu0  ;;  %v1100_v41 = vpop.f32.mrf.mxu1 }
 0x546   :  { %v499_v42 = vsel %vm274_vm6, %v444_v38, -inf }
 0x547   :  { %v393_v44 = vpop.f32.mrf.mxu0  ;;  %500 = vmax.xlane.f32.xlu0 %v499_v42  ;;  %v446_v45 = vpop.f32.mrf.mxu1 }
 0x549   :  { %v1095_v46 = vpop.f32.mrf.mxu0  ;;  %v1101_v47 = vpop.f32.mrf.mxu1 }
 0x54b   :  { %v493_v48 = vpop.f32.mrf.mxu0 }
 0x54c   :  { %v494_v49 = vadd.f32 %v493_v48, %v1350_v51 }
 0x54d   :  { %v1106_v50 = vpop.f32.mrf.mxu0 }
 0x54e   :  { %v502_v52 = vsel %vm274_vm6, %v494_v49, -inf }
 0x54f   :  { %503 = vmax.xlane.f32.xlu1 %v502_v52  ;;  %v496_v53 = vpop.f32.mrf.mxu0  ;;  %v1171_v52 = vld [vmem:[%s1505_s9 + $0x8] sm:$0xff]  }
 0x550   :  { %v1172_v53 = vld [vmem:[%s1505_s9] sm:$0xff]  }
 0x551   :  { %v1107_v54 = vpop.f32.mrf.mxu0 }
 0x560   :  { %571 = vrot.lane.b32.xlu1 %v1334_v43, %s1219_s19 }
 0x5d0   :  { %v501_v55 = vpop.xlane.xlu0 %500 }
 0x5d1   :  { %v505_v56 = vsub.f32 %v444_v38, %v501_v55 }
 0x5d3   :  { %v507_v57 = vmul.f32 1.442695, %v505_v56 }
 0x5d5   :  { %1193 = vpow2.f32 %v507_v57 }
 0x5d8   :  { %v504_v58 = vpop.xlane.xlu1 %503 }
 0x5d9   :  { %v506_v59 = vsub.f32 %v494_v49, %v504_v58 }
 0x5db   :  { %v509_v60 = vmul.f32 1.442695, %v506_v59 }
 0x5dc   :  { %v572_v61 = vpop.permute.xlu1 %571 }
 0x5dd   :  { %1195 = vpow2.f32 %v509_v60  ;;  %v577_v51 = vsel %vm304_vm7, %v572_v61, 0 }
 0x5de   :  { %1115 = vmatpush3.bf16.msra.mxu0 %v577_v51  ;;  %v1006_v51 = vld [vmem:[%s1506_s7] ss:$0 sm:$0xff] }
 0x5df   :  { %1126 = vmatprep.subr.bf16.mxu0 %v1213_v15 }
 0x5e2   :  { %v1194_v62 = vpop.eup %1193 }
 0x5e3   :  { %v511_v63 = vsel %vm274_vm6, %v1194_v62, 0.0 }
 0x5e4   :  { %512 = vadd.xlane.f32.xlu0 %v511_v63 }
 0x5ea   :  { %v1196_v0 = vpop.eup %1195 }
 0x5eb   :  { %v514_v43 = vsel %vm274_vm6, %v1196_v0, 0.0 }
 0x5ec   :  { %515 = vadd.xlane.f32.xlu0 %v514_v43  ;;  %v1007_v43 = vld [vmem:[%s1507_s8] ss:$0 sm:$0xff] }
 0x602   :  { %523 = vrot.lane.b32.xlu0 %v1331_v39, %s1219_s19 }
 0x66d   :  { %v513_v3 = vpop.xlane.xlu0 %512 }
 0x66e   :  { %1197 = vrcp.f32 %v513_v3 }
 0x675   :  { %v516_v4 = vpop.xlane.xlu0 %515 }
 0x676   :  { %1199 = vrcp.f32 %v516_v4 }
 0x679   :  { %v524_v5 = vpop.permute.xlu0 %523 }
 0x67a   :  { %v529_v6 = vsel %vm304_vm7, %v524_v5, 0 }
 0x67b   :  { %v1198_v7 = vpop.eup %1197  ;;  %1109 = vmatpush3.bf16.msra.mxu1 %v529_v6 }
 0x67c   :  { %v519_v8 = vmul.f32 %v1198_v7, %v1194_v62  ;;  %1120 = vmatprep.subr.bf16.mxu1 %v1213_v15  ;;  %v1173_v7 = vld [vmem:[%s1508_s11 + $0x38] sm:$0xff]  }
 0x67e   :  { %v521_v9 = vpack.c.bf16 %v519_v8, %v519_v8  ;;  %v1174_v8 = vld [vmem:[%s1508_s11 + $0x30] sm:$0xff]  }
 0x680   :  { %1111 = vmatmul.mubr.msk.bf16.vlgmr.msra.gmra.mxu1 %vm274_vm6, %v521_v9  ;;  %v1175_v9 = vld [vmem:[%s1508_s11 + $0x28] sm:$0xff]  }
 0x681   :  { %1122 = vmatprep.mubr.msk.bf16.mxu1 %vm1214_vm1, %v1213_v15  ;;  %1121 = vmatpush3.bf16.msra.mxu1 %v1170_v13  ;;  %v1180_v13 = vld [vmem:[%s1508_s11] sm:$0xff]  }
 0x682   :  { %1132 = vmatprep.subr.bf16.mxu1 %v1213_v15 }
 0x683   :  { %v1200_v10 = vpop.eup %1199 }
 0x684   :  { %v520_v39 = vmul.f32 %v1200_v10, %v1196_v0  ;;  %v1176_v10 = vld [vmem:[%s1508_s11 + $0x20] sm:$0xff]  }
 0x686   :  { %v522_v12 = vpack.c.bf16 %v520_v39, %v520_v39  ;;  %v1177_v39 = vld [vmem:[%s1508_s11 + $0x18] sm:$0xff]  }
 0x688   :  { %1117 = vmatmul.mubr.msk.bf16.vlgmr.msra.gmra.mxu0 %vm274_vm6, %v522_v12  ;;  %v1179_v12 = vld [vmem:[%s1508_s11 + $0x8] sm:$0xff]  }
 0x689   :  { %1127 = vmatpush3.bf16.msra.mxu0 %v1169_v11  ;;  %1128 = vmatprep.mubr.msk.bf16.mxu0 %vm1214_vm1, %v1213_v15  ;;  %v1178_v11 = vld [vmem:[%s1508_s11 + $0x10] sm:$0xff]  }
 0x68a   :  { %1140 = vmatprep.subr.bf16.mxu0 %v1213_v15 }
 0x690   :  { %1129 = vmatmul.mubr.msk.bf16.vlgmr.msra.gmra.mxu0 %vm179_vm2, %v396_v37 }
 0x691   :  { %1156 = vmatprep.mubr.msk.bf16.mxu0 %vm1214_vm1, %v1213_v15  ;;  %1141 = vmatpush3.bf16.msra.mxu0 %v1173_v7 }
 0x692   :  { %1142 = vmatprep.subr.bf16.mxu0 %v1213_v15 }
 0x695   :  { %1143 = vmatpush3.bf16.msra.mxu0 %v1174_v8 }
 0x696   :  { %1144 = vmatprep.subr.bf16.mxu0 %v1213_v15 }
 0x699   :  { %1145 = vmatpush3.bf16.msra.mxu0 %v1175_v9 }
 0x69a   :  { %1146 = vmatprep.subr.bf16.mxu0 %v1213_v15 }
 0x69d   :  { %1147 = vmatpush3.bf16.msra.mxu0 %v1176_v10 }
 0x69e   :  { %1148 = vmatprep.subr.bf16.mxu0 %v1213_v15 }
 0x6a1   :  { %1149 = vmatpush3.bf16.msra.mxu0 %v1177_v39 }
 0x6a2   :  { %1150 = vmatprep.subr.bf16.mxu0 %v1213_v15 }
 0x6a5   :  { %1151 = vmatpush3.bf16.msra.mxu0 %v1178_v11 }
 0x6a6   :  { %1152 = vmatprep.subr.bf16.mxu0 %v1213_v15 }
 0x6a9   :  { %1153 = vmatpush3.bf16.msra.mxu0 %v1179_v12 }
 0x6aa   :  { %1154 = vmatprep.subr.bf16.mxu0 %v1213_v15 }
 0x6ad   :  { %1155 = vmatpush3.bf16.msra.mxu0 %v1180_v13 }
 0x740   :  { %v565_v14 = vpop.f32.mrf.mxu1 }
 0x742   :  { %v1112_v16 = vpop.f32.mrf.mxu1 }
 0x744   :  { %v568_v17 = vpop.f32.mrf.mxu1 }
 0x746   :  { %v1113_v18 = vpop.f32.mrf.mxu1 }
 0x748   :  { %v613_v19 = vpop.f32.mrf.mxu0 }
 0x749   :  { %v619_v20 = vpack.c.bf16 %v613_v19, %v565_v14  ;;  %v1008_v14 = vld [vmem:[%s1509_s10] ss:$0 sm:$0xff] }
 0x74a   :  { %v1118_v21 = vpop.f32.mrf.mxu0 }
 0x74b   :  { %1123 = vmatmul.mubr.msk.bf16.vlgmr.msra.gmra.mxu1 %vm179_vm2, %v619_v20 }
 0x74c   :  { %v616_v22 = vpop.f32.mrf.mxu0  ;;  %1136 = vmatprep.mubr.msk.bf16.mxu1 %vm1214_vm1, %v1213_v15  ;;  %1133 = vmatpush3.bf16.msra.mxu1 %v1171_v52 }
 0x74d   :  { %1134 = vmatprep.subr.bf16.mxu1 %v1213_v15 }
 0x74e   :  { %v1119_v23 = vpop.f32.mrf.mxu0 }
 0x750   :  { %v715_v24 = vpop.f32.mrf.mxu0  ;;  %1135 = vmatpush3.bf16.msra.mxu1 %v1172_v53 }
 0x752   :  { %v1130_v25 = vpop.f32.mrf.mxu0 }
 0x754   :  { %v718_v26 = vpop.f32.mrf.mxu0 }
 0x756   :  { %v1131_v27 = vpop.f32.mrf.mxu0 }
 0x80b   :  { %v665_v28 = vpop.f32.mrf.mxu1 }
 0x80c   :  { %v716_v29 = vadd.f32 %v715_v24, %v665_v28 }
 0x80d   :  { %v1124_v31 = vpop.f32.mrf.mxu1 }
 0x80e   :  { %v722_v32 = vadd.f32 %v1293_v1, %v716_v29 }
 0x80f   :  { %v668_v33 = vpop.f32.mrf.mxu1 }
 0x810   :  { %v1426_v34 = vadd.f32 %v1005_v30, %v722_v32  ;;  %v719_v35 = vadd.f32 %v718_v26, %v668_v33 }
 0x811   :  { %v1125_v36 = vpop.f32.mrf.mxu1 }
 0x812   :  { %v723_v37 = vadd.f32 %v1295_v2, %v719_v35  ;;  %v735_v38 = vsel %vm51_vm0, %v1426_v34, 0.0  ;;  %v1014_v35 = vld [vmem:[%s1510_s12] ss:$0 sm:$0xff] }
 0x813   :  { %736 = vadd.xlane.f32.xlu1 %v735_v38 }
 0x814   :  { %v1431_v40 = vadd.f32 %v1005_v30, %v723_v37 }
 0x816   :  { %v738_v41 = vsel %vm51_vm0, %v1431_v40, 0.0 }
 0x817   :  { %739 = vadd.xlane.f32.xlu0 %v738_v41 }
 0x89c   :  { %v737_v42 = vpop.xlane.xlu1 %736 }
 0x89d   :  { %v741_v44 = vmul.f32 0.03125, %v737_v42 }
 0x89f   :  { %v743_v1 = vsub.f32 %v1426_v34, %v741_v44 }
 0x8a0   :  { %v740_v45 = vpop.xlane.xlu0 %739 }
 0x8a1   :  { %v742_v46 = vmul.f32 0.03125, %v740_v45  ;;  %v745_v47 = vmul.f32 %v743_v1, %v743_v1 }
 0x8a3   :  { %v744_v48 = vsub.f32 %v1431_v40, %v742_v46  ;;  %v747_v2 = vsel %vm51_vm0, %v745_v47, 0.0 }
 0x8a4   :  { %748 = vadd.xlane.f32.xlu0 %v747_v2 }
 0x8a5   :  { %v746_v49 = vmul.f32 %v744_v48, %v744_v48 }
 0x8a7   :  { %v750_v50 = vsel %vm51_vm0, %v746_v49, 0.0 }
 0x8a8   :  { %751 = vadd.xlane.f32.xlu1 %v750_v50 }
 0x92d   :  { %v749_v54 = vpop.xlane.xlu0 %748 }
 0x92e   :  { %v753_v55 = vmul.f32 0.03125, %v749_v54 }
 0x930   :  { %v755_v56 = vadd.f32 1e-05, %v753_v55 }
 0x931   :  { %v752_v57 = vpop.xlane.xlu1 %751 }
 0x932   :  { %1201 = vrsqrt.f32 %v755_v56  ;;  %v754_v58 = vmul.f32 0.03125, %v752_v57 }
 0x934   :  { %v756_v59 = vadd.f32 1e-05, %v754_v58 }
 0x936   :  { %1203 = vrsqrt.f32 %v756_v59 }
 0x93f   :  { %v1202_v60 = vpop.eup %1201 }
 0x940   :  { %v759_v61 = vmul.f32 %v1202_v60, %v743_v1 }
 0x942   :  { %v767_v0 = vmul.f32 %v1006_v51, %v759_v61 }
 0x943   :  { %v1204_v62 = vpop.eup %1203 }
 0x944   :  { %v760_v63 = vmul.f32 %v1204_v62, %v744_v48  ;;  %v775_v4 = vadd.f32 %v1007_v43, %v767_v0 }
 0x946   :  { %v768_v3 = vmul.f32 %v1006_v51, %v760_v63 }
 0x948   :  { %v776_v5 = vadd.f32 %v1007_v43, %v768_v3 }
 0x94a   :  { %v777_v6 = vpack.c.bf16 %v776_v5, %v775_v4 }
 0x94c   :  { %1137 = vmatmul.mubr.msk.bf16.vlgmr.msra.gmra.mxu1 %vm51_vm0, %v777_v6 }
 0xa0c   :  { %v838_v16 = vpop.f32.mrf.mxu1 }
 0xa0d   :  { %v839_v17 = vadd.f32 %v1008_v14, %v838_v16 }
 0xa0e   :  { %v1138_v18 = vpop.f32.mrf.mxu1 }
 0xa0f   :  { %v1012_v19 = vmul.f32 -1.702, %v839_v17 }
 0xa10   :  { %v841_v20 = vpop.f32.mrf.mxu1 }
 0xa11   :  { %v849_v21 = vmul.f32 1.442695, %v1012_v19  ;;  %v842_v22 = vadd.f32 %v1008_v14, %v841_v20 }
 0xa12   :  { %v1139_v23 = vpop.f32.mrf.mxu1 }
 0xa13   :  { %1205 = vpow2.f32 %v849_v21  ;;  %v1013_v24 = vmul.f32 -1.702, %v842_v22 }
 0xa15   :  { %v851_v15 = vmul.f32 1.442695, %v1013_v24 }
 0xa17   :  { %1207 = vpow2.f32 %v851_v15 }
 0xa20   :  { %v1206_v25 = vpop.eup %1205 }
 0xa21   :  { %v853_v26 = vadd.f32 1.0, %v1206_v25 }
 0xa23   :  { %1209 = vrcp.f32 %v853_v26 }
 0xa24   :  { %v1208_v27 = vpop.eup %1207 }
 0xa25   :  { %v854_v28 = vadd.f32 1.0, %v1208_v27 }
 0xa27   :  { %1211 = vrcp.f32 %v854_v28 }
 0xa30   :  { %v1210_v29 = vpop.eup %1209 }
 0xa31   :  { %v859_v31 = vmul.f32 %v1210_v29, %v839_v17 }
 0xa34   :  { %v1212_v30 = vpop.eup %1211 }
 0xa35   :  { %v860_v32 = vmul.f32 %v1212_v30, %v842_v22 }
 0xa37   :  { %v861_v33 = vpack.c.bf16 %v860_v32, %v859_v31 }
 0xa39   :  { %1157 = vmatmul.mubr.bf16.vlgmr.msra.gmra.mxu0 %v861_v33 }
 0xaf9   :  { %v967_v36 = vpop.f32.mrf.mxu0 }
 0xafa   :  { %v968_v37 = vadd.f32 %v1014_v35, %v967_v36 }
 0xafb   :  { %v1158_v38 = vpop.f32.mrf.mxu0 }
 0xafc   :  { %v974_v41 = vadd.f32 %v968_v37, %v1426_v34 }
 0xafd   :  { %v970_v42 = vpop.f32.mrf.mxu0 }
 0xafe   :  { %v976_v44 = vpack.c.bf16 %v974_v41, %v974_v41  ;;  %v971_v1 = vadd.f32 %v1014_v35, %v970_v42 }
 0xaff   :  { %v1159_v45 = vpop.f32.mrf.mxu0 }
 0xb00   :  { %979 = vst.msk [vmem:[%s1511_s13] sm:$0xf] %vm978_vm8, %v976_v44  ;;  %v975_v46 = vadd.f32 %v971_v1, %v1431_v40 }
 0xb02   :  { %v977_v47 = vpack.c.bf16 %v975_v46, %v975_v46 }
 0xb04   :  { %980 = vst.msk [vmem:[%s1511_s13 + $0x4] sm:$0xf] %vm978_vm8, %v977_v47 }

</bundles_post_ra>
